<compile_context>
chip_gen: v6e
topology: v6e:2x2x1
jax: 0.10.0
libtpu: 0.0.40
codegen_flags: <defaults>
</compile_context>

<pallas_src>
from enum import Enum

import jax
import jax.numpy as jnp
from jax.experimental import pallas as pl
from jax.experimental.pallas import tpu as pltpu


class BackgroundStyle(Enum):
    BLACK = 0
    WHITE = 1
    RAND = 2
    RAND_FFT = 3


# ----------------------------------------------------------------------------
# Background generators (JAX glue — FFT / RNG streams have no Pallas FFT /
# torch-identical PRNG equivalent; they are streamed into the blend kernel)
# ----------------------------------------------------------------------------
def rand_uniform(key, shape, dtype=jnp.float32):
    """Uniform [0, 1) background (matches torch.rand_like(img) semantics)."""
    return jax.random.uniform(key, shape, dtype=jnp.float32).astype(dtype)


def rand_fft(key, shape, dtype=jnp.float32):
    """1/f-scaled random spectrum -> inverse rFFT -> normalized to ~[0, 1]."""
    N, C, H, W = shape
    fy = jnp.fft.fftfreq(H)[:, None]
    fx = jnp.fft.rfftfreq(W)[None, :]
    freqs = jnp.sqrt(fy * fy + fx * fx)
    scale = 1.0 / jnp.maximum(freqs, 1.0 / max(H, W))          # (H, W//2+1)
    kr, ki = jax.random.split(key)
    re = jax.random.normal(kr, (N, C, H, W // 2 + 1))
    im = jax.random.normal(ki, (N, C, H, W // 2 + 1))
    spec = (re + 1j * im) * scale
    img = jnp.fft.irfft2(spec, s=(H, W))
    img = img / (jnp.std(img) + 1e-6) * 0.2 + 0.5
    return jnp.clip(img, 0.0, 1.0).astype(dtype)
    # TODO(synk): lucid_torch's exact rand_fft parameterization (decay power,
    # per-channel color correlation, per-image normalization) is not
    # reproduced; shape/range match.


# ----------------------------------------------------------------------------
# Pallas kernels — each gets a full-channel data block (TN, C, TC) and writes
# the blended image block (TN, C-1, TC).  Channel/alpha split is a static Ref
# slice (free view); arithmetic is done in f32 and cast on the final store.
# ----------------------------------------------------------------------------
def _blend_black_kernel(data_ref, out_ref):
    c = out_ref.shape[1]                               # = C - 1 (static)
    img = data_ref[:, :c, :].astype(jnp.float32)
    a = data_ref[:, c:, :].astype(jnp.float32)         # (TN, 1, TC) broadcast
    out_ref[...] = (img * a).astype(out_ref.dtype)


def _blend_white_kernel(data_ref, out_ref):
    c = out_ref.shape[1]
    img = data_ref[:, :c, :].astype(jnp.float32)
    a = data_ref[:, c:, :].astype(jnp.float32)
    # img*a + 1*(1-a)  ==  1 + a*(img - 1)
    out_ref[...] = (1.0 + a * (img - 1.0)).astype(out_ref.dtype)


def _blend_bg_kernel(data_ref, bg_ref, out_ref):
    c = out_ref.shape[1]
    img = data_ref[:, :c, :].astype(jnp.float32)
    a = data_ref[:, c:, :].astype(jnp.float32)
    bg = bg_ref[...].astype(jnp.float32)               # (TN, C-1, TC)
    out_ref[...] = (bg + a * (img - bg)).astype(out_ref.dtype)


# ----------------------------------------------------------------------------
# Tiling helpers / wrapper
# ----------------------------------------------------------------------------
_TC_MAX = 65536                       # max lanes per block (multiple of 128)
_TARGET_BLOCK_BYTES = 1 << 20         # aim for ~1 MiB of raw `data` per step


def _pick_tiles(N, C, HW, itemsize, tc_max, target_bytes):
    """Pick (TN, TC, grid) so every grid step moves a large, legal block."""
    if HW <= tc_max:
        tc = HW                        # full extent: always a legal block dim
    else:
        tc = max(128, (tc_max // 128) * 128)   # partial lane blocks need %128
    target_elems = max(1, target_bytes // max(1, itemsize))
    tn = max(1, min(N, target_elems // max(1, C * tc)))
    grid = (pl.cdiv(N, tn), pl.cdiv(HW, tc))   # ragged last blocks are fine
    return tn, tc, grid


def tfms_mixin_alpha_channel(data, background=BackgroundStyle.RAND_FFT, *,
                             key=None, tc_max=_TC_MAX,
                             target_block_bytes=_TARGET_BLOCK_BYTES):
    if not isinstance(background, BackgroundStyle):
        raise TypeError()
    if background in (BackgroundStyle.RAND, BackgroundStyle.RAND_FFT) and key is None:
        raise ValueError("RAND / RAND_FFT backgrounds require a PRNG `key`.")

    N, C, H, W = data.shape
    HW = H * W
    c_img = C - 1
    data3 = data.reshape(N, C, HW)     # contiguous reshape, no copy

    itemsize = jnp.dtype(data.dtype).itemsize
    tn, tc, grid = _pick_tiles(N, C, HW, itemsize, tc_max, target_block_bytes)

    # img & alpha come from the SAME array block — channel split is in-kernel,
    # so neither the channel slice nor the alpha broadcast touches HBM.
    data_spec = pl.BlockSpec((tn, C, tc), lambda i, j: (i, 0, j))
    out_spec = pl.BlockSpec((tn, c_img, tc), lambda i, j: (i, 0, j))
    out_shape = jax.ShapeDtypeStruct((N, c_img, HW), data.dtype)
    cparams = pltpu.CompilerParams(
        dimension_semantics=("parallel", "parallel"),   # megacore-shardable
        vmem_limit_bytes=32 * 1024 * 1024)

    if background is BackgroundStyle.BLACK:
        out3 = pl.pallas_call(
            _blend_black_kernel, out_shape=out_shape, grid=grid,
            in_specs=[data_spec], out_specs=out_spec,
            compiler_params=cparams)(data3)

    elif background is BackgroundStyle.WHITE:
        out3 = pl.pallas_call(
            _blend_white_kernel, out_shape=out_shape, grid=grid,
            in_specs=[data_spec], out_specs=out_spec,
            compiler_params=cparams)(data3)

    elif background in (BackgroundStyle.RAND, BackgroundStyle.RAND_FFT):
        if background is BackgroundStyle.RAND:
            bg = rand_uniform(key, (N, c_img, H, W), dtype=data.dtype)
        else:
            bg = rand_fft(key, (N, c_img, H, W), dtype=data.dtype)
        bg3 = bg.reshape(N, c_img, HW)
        bg_spec = pl.BlockSpec((tn, c_img, tc), lambda i, j: (i, 0, j))
        out3 = pl.pallas_call(
            _blend_bg_kernel, out_shape=out_shape, grid=grid,
            in_specs=[data_spec, bg_spec], out_specs=out_spec,
            compiler_params=cparams)(data3, bg3)

    else:
        raise NotImplementedError

    return out3.reshape(N, c_img, H, W)


if __name__ == "__main__":
    key = jax.random.PRNGKey(0)
    k_data, k_fft, k_rand, k_rag = jax.random.split(key, 4)

    # data: NCHW, 4 channels = 3 RGB + 1 alpha
    data = jax.random.uniform(k_data, (2, 4, 16, 16), dtype=jnp.float32)
    img, alpha = data[:, :-1], data[:, -1:]

    # RAND_FFT (module default) vs pure-JAX reference
    out_fft = jax.block_until_ready(
        tfms_mixin_alpha_channel(data, BackgroundStyle.RAND_FFT, key=k_fft))
    bg_ref = rand_fft(k_fft, img.shape, dtype=img.dtype)
    ref_fft = img * alpha + bg_ref * (1.0 - alpha)
    assert out_fft.shape == (2, 3, 16, 16)
    assert jnp.allclose(out_fft, ref_fft, atol=1e-5), "RAND_FFT mismatch"

    # BLACK / WHITE vs references
    out_b = jax.block_until_ready(
        tfms_mixin_alpha_channel(data, BackgroundStyle.BLACK))
    assert jnp.allclose(out_b, img * alpha, atol=1e-5), "BLACK mismatch"

    out_w = jax.block_until_ready(
        tfms_mixin_alpha_channel(data, BackgroundStyle.WHITE))
    assert jnp.allclose(out_w, img * alpha + (1.0 - alpha), atol=1e-5), "WHITE mismatch"

    # RAND (streamed jax.random.uniform background) — exact reference check
    out_r = jax.block_until_ready(
        tfms_mixin_alpha_channel(data, BackgroundStyle.RAND, key=k_rand))
    bg_r = rand_uniform(k_rand, img.shape, dtype=img.dtype)
    ref_r = img * alpha + bg_r * (1.0 - alpha)
    assert out_r.shape == (2, 3, 16, 16)
    assert jnp.allclose(out_r, ref_r, atol=1e-5), "RAND mismatch"

    # Ragged-tiling path: HW = 130 (not %128), tiny tile caps force a
    # (cdiv(3,2), cdiv(130,128)) grid with partial last blocks on both axes.
    data_rg = jax.random.uniform(k_rag, (3, 4, 10, 13), dtype=jnp.float32)
    img_rg, alpha_rg = data_rg[:, :-1], data_rg[:, -1:]
    out_rg = jax.block_until_ready(
        tfms_mixin_alpha_channel(data_rg, BackgroundStyle.WHITE,
                                 tc_max=128, target_block_bytes=4096))
    assert jnp.allclose(out_rg, img_rg * alpha_rg + (1.0 - alpha_rg),
                        atol=1e-5), "ragged-tile WHITE mismatch"

    print("KERNEL_OK")
</pallas_src>

<mosaic_0001>
module attributes {stable_mosaic.version = 11 : i64} {
  func.func @_blend_bg_kernel(%arg0: i32, %arg1: i32, %arg2: memref<2x4x256xf32, #tpu.memory_space<vmem>>, %arg3: memref<2x3x256xf32, #tpu.memory_space<vmem>>, %arg4: memref<2x3x256xf32, #tpu.memory_space<vmem>>) attributes {dimension_semantics = [#tpu.dimension_semantics<parallel>, #tpu.dimension_semantics<parallel>], iteration_bounds = array<i64: 1, 1>, scalar_prefetch = 0 : i64, scratch_operands = 0 : i64, tpu.core_type = #tpu.core_type<tc>, window_params = [{transform_indices = @transform_0, window_bounds = array<i64: 2, 4, 256>}, {transform_indices = @transform_1, window_bounds = array<i64: 2, 3, 256>}, {transform_indices = @transform_2, window_bounds = array<i64: 2, 3, 256>}]} {
    %c0 = arith.constant 0 : index
    %c0_0 = arith.constant 0 : index
    %c0_1 = arith.constant 0 : index
    %0 = vector.load %arg2[%c0, %c0_0, %c0_1] : memref<2x4x256xf32, #tpu.memory_space<vmem>>, vector<2x3x256xf32>
    %c0_2 = arith.constant 0 : index
    %c3 = arith.constant 3 : index
    %c0_3 = arith.constant 0 : index
    %1 = vector.load %arg2[%c0_2, %c3, %c0_3] : memref<2x4x256xf32, #tpu.memory_space<vmem>>, vector<2x1x256xf32>
    %c0_4 = arith.constant 0 : index
    %c0_5 = arith.constant 0 : index
    %c0_6 = arith.constant 0 : index
    %2 = vector.load %arg3[%c0_4, %c0_5, %c0_6] : memref<2x3x256xf32, #tpu.memory_space<vmem>>, vector<2x3x256xf32>
    %3 = arith.subf %0, %2 : vector<2x3x256xf32>
    %4 = vector.broadcast %1 : vector<2x1x256xf32> to vector<2x3x256xf32>
    %5 = arith.mulf %4, %3 : vector<2x3x256xf32>
    %6 = arith.addf %2, %5 : vector<2x3x256xf32>
    %c0_7 = arith.constant 0 : index
    %c0_8 = arith.constant 0 : index
    %c0_9 = arith.constant 0 : index
    %7 = vector.load %arg4[%c0_7, %c0_8, %c0_9] : memref<2x3x256xf32, #tpu.memory_space<vmem>>, vector<2x3x256xf32>
    tpu.vector_store %arg4[%c0_7, %c0_8, %c0_9], %6 {strides = array<i32>} : memref<2x3x256xf32, #tpu.memory_space<vmem>>, vector<2x3x256xf32>,
    return
  }
  func.func @transform_0(%arg0: i32, %arg1: i32) -> (i32, i32, i32) {
    %c0_i32 = arith.constant 0 : i32
    %c0_i32_0 = arith.constant 0 : i32
    return %arg0, %c0_i32, %arg1 : i32, i32, i32
  }
  func.func @transform_1(%arg0: i32, %arg1: i32) -> (i32, i32, i32) {
    %c0_i32 = arith.constant 0 : i32
    %c0_i32_0 = arith.constant 0 : i32
    return %arg0, %c0_i32, %arg1 : i32, i32, i32
  }
  func.func @transform_2(%arg0: i32, %arg1: i32) -> (i32, i32, i32) {
    %c0_i32 = arith.constant 0 : i32
    %c0_i32_0 = arith.constant 0 : i32
    return %arg0, %c0_i32, %arg1 : i32, i32, i32
  }
}

</mosaic_0001>

<bundles_post_ra>
// kernel: tpu_custom_call.1
= control target key start
LH: loop header
LB: loop body
LE: loop exit
PB: predicated region body
PF: predicated region fallthrough
CT: control target
= control target key end

     0   :  { %v23_v0 = vlaneseq  ;;  %s110_s0 = inlined_call_operand.vmem [shape: f32[2,4,256], index: 0, kind: input, shape index: {}]   ;;  %s111_s1 = inlined_call_operand.vmem [shape: f32[2,3,256], index: 1, kind: input, shape index: {}]   ;;  %s112_s2 = inlined_call_operand.vmem [shape: f32[2,3,256], index: 2, kind: output, shape index: {}]  }
   0x1   :  { %v11_v1 = vld [vmem:[%s110_s0] sm:$0x77]  ;;  %v69_v2 = vld [vmem:[%s110_s0 + $0x3] ss:$4 sm:$0x3] }
   0x2   :  { %v17_v3 = vld [vmem:[%s111_s1] sm:$0x77]  ;;  %v24_v4 = vshrl.u32 %v23_v0, 7  ;;  %v12_v5 = vld [vmem:[%s110_s0 + $0x8] sm:$0x77] }
   0x3   :  { %v19_v6 = vsub.f32 %v11_v1, %v17_v3  ;;  %v70_v7 = vld [vmem:[%s110_s0 + $0xb] ss:$4 sm:$0x3]  ;;  %v18_v8 = vld [vmem:[%s111_s1 + $0x8] sm:$0x77] }
   0x4   :  { %v25_v9 = vsub.s32 0, %v24_v4  ;;  %v29_v10 = vsub.s32 1, %v24_v4  ;;  %v20_v11 = vsub.f32 %v12_v5, %v18_v8 }
   0x5   :  { %v45_v12 = vcombine.high %v19_v6, %v19_v6 }
   0x6   :  { %v26_v13 = vrot.slane %v69_v2, %v25_v9  ;;  %v30_v14 = vrot.slane %v69_v2, %v29_v10  ;;  %v34_v15 = vrot.slane %v70_v7, %v25_v9  ;;  %v38_v16 = vrot.slane %v70_v7, %v29_v10 }
   0x7   :  { %v46_v17 = vcombine.high %v20_v11, %v20_v11 }
   0x8   :  { %v49_v18 = vmul.f32 %v26_v13, %v19_v6  ;;  %v50_v19 = vmul.f32 %v45_v12, %v30_v14  ;;  %v51_v20 = vmul.f32 %v34_v15, %v20_v11 }
   0x9   :  { %v52_v21 = vmul.f32 %v46_v17, %v38_v16 }
   0xa   :  { %v57_v22 = vcombine.low %v49_v18, %v50_v19 }
   0xb   :  { %v58_v23 = vcombine.low %v51_v20, %v52_v21 }
   0xc   :  { %v61_v24 = vadd.f32 %v57_v22, %v17_v3 }
   0xd   :  { %v62_v25 = vadd.f32 %v58_v23, %v18_v8 }
   0xe   :  { %63 = vst [vmem:[%s112_s2] sm:$0x77] %v61_v24 }
   0xf   :  { %64 = vst [vmem:[%s112_s2 + $0x8] sm:$0x77] %v62_v25 }

</bundles_post_ra>
